<compile_context>
chip_gen: v5e
topology: v5e:2x2
jax: 0.10.0
libtpu: 0.0.40
codegen_flags: <defaults>
</compile_context>

<pallas_src>
import math
import functools

import jax
import jax.numpy as jnp
from jax import lax
from jax.experimental import pallas as pl
from jax.experimental.pallas import tpu as pltpu


def _make_pe(dim: int, max_len: int = 1000) -> jnp.ndarray:
    """Sinusoidal positional-encoding table, exactly as the PyTorch __init__ (dim even)."""
    position = jnp.arange(max_len, dtype=jnp.float32)[:, None]                      # (max_len, 1)
    div_term = jnp.exp(jnp.arange(0, dim, 2, dtype=jnp.float32)
                       * (-math.log(10000.0) / dim))                                # (dim/2,)
    pe = jnp.zeros((max_len, dim), dtype=jnp.float32)
    pe = pe.at[:, 0::2].set(jnp.sin(position * div_term))
    pe = pe.at[:, 1::2].set(jnp.cos(position * div_term))
    return pe                                                                        # (max_len, dim)


def _pe_kernel(seed_ref, z_ref, pe_ref, o_ref, *, dropout_p: float, training: bool,
               l_padded: int):
    # Batch dim is squeezed away by the BlockSpecs: z_ref / pe_ref / o_ref are all (TL, D),
    # so the PE add is a plain 2-D VPU add with no broadcast_in_dim per grid step.
    y = z_ref[...].astype(jnp.float32) + pe_ref[...]

    if training and dropout_p >= 1.0:
        # torch.nn.Dropout(p=1.0) zeroes everything.
        o_ref[...] = jnp.zeros_like(o_ref)
    elif training and dropout_p > 0.0:
        # TODO(synk): dropout mask is a keyed integer hash, not bit-exact with torch's RNG
        # (keep-probability and 1/(1-p) scaling semantics are identical).
        tl, d = o_ref.shape
        l_tile = pl.program_id(0)
        b = pl.program_id(1)
        # Global flat element index -> mask is independent of the tiling choice.
        base = (b * l_padded + l_tile * tl) * d                       # scalar int32
        row = lax.broadcasted_iota(jnp.int32, (tl, d), 0)
        col = lax.broadcasted_iota(jnp.int32, (tl, d), 1)
        idx = (base + row * d + col).astype(jnp.uint32)
        # Keyed murmur-style finalizer; seed enters twice with a non-linear step between,
        # so distinct seeds do not yield shifted/permuted copies of the same mask.
        s = seed_ref[0].astype(jnp.uint32)
        x = (idx ^ s) * jnp.uint32(0x9E3779B1)
        x = (x ^ (x >> 16)) ^ s
        x = x * jnp.uint32(0x85EBCA6B)
        x = x ^ (x >> 13)
        x = x * jnp.uint32(0xC2B2AE35)
        x = x ^ (x >> 16)
        thresh = jnp.uint32(min(int(dropout_p * 4294967296.0), 0xFFFFFFFF))
        keep = x >= thresh                                            # keep iff uniform >= p
        scale = jnp.float32(1.0 / (1.0 - dropout_p))
        o_ref[...] = jnp.where(keep, y * scale, 0.0).astype(o_ref.dtype)
    else:
        o_ref[...] = y.astype(o_ref.dtype)


def positional_encoding(z, pe, *, dropout_p: float = 0.1, training: bool = False,
                        seed: int = 0, tl=None):
    """z: [B, L, D]; pe: [max_len, D] with max_len >= L. Returns dropout(z + pe[:L])."""
    B, L, D = z.shape
    pe_slice = pe[:L].astype(jnp.float32)                  # glue slicing in plain JAX

    # Tile the sequence dim: ~4 MiB of f32 per z tile keeps per-step DMA large enough to
    # amortize grid overhead, while double-buffered {z, pe, out} tiles (~24 MiB total)
    # stay under the 32 MiB scoped-VMEM default on v5e/v6e and on v7x (64 MiB physical).
    if tl is None:
        target_rows = max(1, (4 * 1024 * 1024) // max(4 * D, 1))
        tl = min(L, target_rows)
        if tl < L:
            tl = max(8, (tl // 8) * 8)                     # keep the (8,128) tiling rule happy
    tl = int(min(tl, L))
    num_l = pl.cdiv(L, tl)
    l_padded = int(num_l * tl)

    seed_arr = jnp.asarray([seed], dtype=jnp.int32)
    kernel = functools.partial(_pe_kernel, dropout_p=float(dropout_p),
                               training=bool(training), l_padded=l_padded)

    return pl.pallas_call(
        kernel,
        out_shape=jax.ShapeDtypeStruct((B, L, D), z.dtype),
        grid_spec=pltpu.PrefetchScalarGridSpec(
            num_scalar_prefetch=1,                         # seed lives in SMEM
            grid=(num_l, B),                               # batch innermost: pe tile reused across B
            in_specs=[
                # leading batch dim squeezed -> kernel sees (TL, D) tiles
                pl.BlockSpec((None, tl, D), lambda l, b, seed: (b, l, 0)),   # z
                pl.BlockSpec((tl, D),       lambda l, b, seed: (l, 0)),      # pe (tracks the L tile)
            ],
            out_specs=pl.BlockSpec((None, tl, D), lambda l, b, seed: (b, l, 0)),
        ),
        compiler_params=pltpu.CompilerParams(
            # No cross-step carry: both grid axes independent -> shard across v7x's 2 TCs.
            dimension_semantics=("parallel", "parallel")),
    )(seed_arr, z, pe_slice)


if __name__ == "__main__":
    B, L, D = 2, 8, 32
    MAX_LEN = 1000

    key = jax.random.PRNGKey(0)
    z = jax.random.normal(key, (B, L, D), dtype=jnp.float32)
    pe = _make_pe(D, MAX_LEN)
    ref = z + pe[:L][None, :, :]

    # Eval mode: dropout is identity -> must match the pure-JAX reference.
    out_eval = jax.block_until_ready(
        positional_encoding(z, pe, dropout_p=0.1, training=False))
    assert out_eval.shape == (B, L, D)
    assert jnp.allclose(out_eval, ref, atol=1e-6, rtol=1e-6), "eval-mode mismatch"

    # Training mode: every element must be either 0 or (z + pe) * 1/(1-p).
    p = 0.1
    out_train = jax.block_until_ready(
        positional_encoding(z, pe, dropout_p=p, training=True, seed=42))
    assert out_train.shape == (B, L, D)
    scaled = ref * jnp.float32(1.0 / (1.0 - p))
    ok = jnp.isclose(out_train, 0.0, atol=1e-6) | jnp.isclose(out_train, scaled,
                                                              rtol=1e-5, atol=1e-6)
    assert bool(jnp.all(ok)), "training-mode output is not {0, scaled(z+pe)}"

    print("KERNEL_OK")
</pallas_src>

<mosaic_0001>
module attributes {stable_mosaic.version = 11 : i64} {
  func.func @_pe_kernel(%arg0: i32, %arg1: i32, %arg2: memref<1xi32, #tpu.memory_space<smem>>, %arg3: memref<1x8x32xf32, #tpu.memory_space<vmem>>, %arg4: memref<8x32xf32, #tpu.memory_space<vmem>>, %arg5: memref<1x8x32xf32, #tpu.memory_space<vmem>>) attributes {dimension_semantics = [#tpu.dimension_semantics<parallel>, #tpu.dimension_semantics<parallel>], iteration_bounds = array<i64: 1, 2>, scalar_prefetch = 1 : i64, scratch_operands = 0 : i64, tpu.core_type = #tpu.core_type<tc>, window_params = [{transform_indices = @transform_0, window_bounds = array<i64: 1, 8, 32>}, {transform_indices = @transform_1, window_bounds = array<i64: 8, 32>}, {transform_indices = @transform_2, window_bounds = array<i64: 1, 8, 32>}]} {
    %c0 = arith.constant 0 : index
    %c0_0 = arith.constant 0 : index
    %c0_1 = arith.constant 0 : index
    %0 = vector.load %arg3[%c0, %c0_0, %c0_1] : memref<1x8x32xf32, #tpu.memory_space<vmem>>, vector<1x8x32xf32>
    %1 = vector.shape_cast %0 : vector<1x8x32xf32> to vector<8x32xf32>
    %c0_2 = arith.constant 0 : index
    %c0_3 = arith.constant 0 : index
    %2 = vector.load %arg4[%c0_2, %c0_3] : memref<8x32xf32, #tpu.memory_space<vmem>>, vector<8x32xf32>
    %3 = arith.addf %1, %2 : vector<8x32xf32>
    %c0_4 = arith.constant 0 : index
    %c0_5 = arith.constant 0 : index
    %c0_6 = arith.constant 0 : index
    %4 = vector.load %arg5[%c0_4, %c0_5, %c0_6] : memref<1x8x32xf32, #tpu.memory_space<vmem>>, vector<1x8x32xf32>
    %5 = vector.shape_cast %4 : vector<1x8x32xf32> to vector<8x32xf32>
    %6 = vector.shape_cast %3 : vector<8x32xf32> to vector<1x8x32xf32>
    tpu.vector_store %arg5[%c0_4, %c0_5, %c0_6], %6 {strides = array<i32>} : memref<1x8x32xf32, #tpu.memory_space<vmem>>, vector<1x8x32xf32>,
    return
  }
  func.func @transform_0(%arg0: i32, %arg1: i32, %arg2: memref<1xi32, #tpu.memory_space<smem>>) -> (i32, i32, i32) {
    %c0_i32 = arith.constant 0 : i32
    %c0_i32_0 = arith.constant 0 : i32
    return %arg1, %arg0, %c0_i32 : i32, i32, i32
  }
  func.func @transform_1(%arg0: i32, %arg1: i32, %arg2: memref<1xi32, #tpu.memory_space<smem>>) -> (i32, i32) {
    %c0_i32 = arith.constant 0 : i32
    %c0_i32_0 = arith.constant 0 : i32
    return %arg0, %c0_i32 : i32, i32
  }
  func.func @transform_2(%arg0: i32, %arg1: i32, %arg2: memref<1xi32, #tpu.memory_space<smem>>) -> (i32, i32, i32) {
    %c0_i32 = arith.constant 0 : i32
    %c0_i32_0 = arith.constant 0 : i32
    return %arg1, %arg0, %c0_i32 : i32, i32, i32
  }
}

</mosaic_0001>

<bundles_post_ra>
// kernel: tpu_custom_call.1
= control target key start
LH: loop header
LB: loop body
LE: loop exit
PB: predicated region body
PF: predicated region fallthrough
CT: control target
= control target key end

     0   :  { %9 = vsyncpa [#allocation5], 0  ;;  %s722_s0 = inlined_call_operand.<no memory space> [shape: s32[1], index: 0, kind: input, shape index: {}]   ;;  %s723_s1 = inlined_call_operand.hbm [shape: f32[2,8,32], index: 1, kind: input, shape index: {}]   ;;  %s724_s2 = inlined_call_operand.hbm [shape: f32[8,32], index: 2, kind: input, shape index: {}]   ;;  %s725_s3 = inlined_call_operand.hbm [shape: f32[2,8,32], index: 3, kind: output, shape index: {}]  }
   0x1   :  { %11 = vsyncpa [#allocation5 + $0x1], 0 }
   0x2   :  { %12 = vsyncpa [#allocation8], 0 }
   0x3   :  { %13 = vsyncpa [#allocation6], 0 }
   0x4   :  { %15 = vsyncpa [#allocation6 + $0x1], 0  ;;  %s573_s12 = smov 0   ;;  %s575_s13 = smov 0  }
   0x5   :  { %s577_s14 = smov 0   ;;  %s579_s0 = smov 0  }
   0x6   :  { %s581_s15 = smov 0   ;;  %s583_s16 = smov 0  }
   0x7 LB: > { %s316_s17 = sadd.s32 4294967295, %s550_s16   ;;  %s317_s18 = sadd.s32 4294967294, %s550_s16   ;;  %s550_s16 = sphi %s583_s16, %s21_s16   ;;  %s546_s15 = sphi %s581_s15, %s737_s15   ;;  %s542_s0 = sphi %s579_s0, %s736_s0   ;;  %s538_s14 = sphi %s577_s14, %s735_s14   ;;  %s534_s13 = sphi %s575_s13, %s734_s13   ;;  %s530_s12 = sphi %s573_s12, %s733_s12  }
   0x8   : > { %p55_p0 = scmp.ne.s32.totalorder %s534_s13, %s530_s12  ;;  %p607_p1 = scmp.eq.s32.totalorder %s316_s17, 0 }
   0x9   : > { %p611_p2 = scmp.eq.s32.totalorder %s316_s17, 1  ;;  %p113_p3 = scmp.eq.s32.totalorder %s317_s18, 1 }
   0xa   : > { %p617_p4 = por %p607_p1, %p55_p0  ;;  %p318_p5 = scmp.ge.s32.totalorder %s550_s16, 1 }
   0xb   : > { %p622_p6 = por %p113_p3, %p55_p0  ;;  %p120_p7 = scmp.lt.s32.totalorder %s550_s16, 3 }
   0xc   : > { %s134_s25 = sshll.u32 %s724_s2, 4  ;;  %p320_p9 = scmp.ge.s32.totalorder %s550_s16, 2  ;;  %s135_s25 = int_to_ptr.hbm [resolvable:$true] %s134_s25 }
   0xd   : > { %p630_p8 = pnand %p318_p5, %p120_p7  ;;  %s552_s27 = smov [#allocation7]  }
   0xe   : > { %s136_s28 = sshll.u32 %s552_s27, 4  ;;  %s30_s29 = sadd.s32 1, %s546_s15  ;;  %s137_s28 = int_to_ptr.vmem [resolvable:$true] %s136_s28 }
   0xf   : > { %p339_p10 = pneg %p630_p8  ;;  %p31_p12 = scmp.ge.s32.totalorder %s30_s29, 2 }
  0x10   : > { %s42_s30 = sadd.s32 1, %s538_s14  ;;  %p49_p13 = scmp.ne.s32.totalorder %s538_s14, %s534_s13 }
  0x11   : > { %p340_p11 = pnand %p339_p10, %p607_p1  ;;  %p50_p0 = scmp.eq.s32.totalorder %s550_s16, 0 }
  0x12   : > { %s739_s29 = smov (%p31_p12, %s30_s29), 0  ;;  %p652_p5 = por %p611_p2, %p49_p13 }
  0x13   : > { %342 = dma.hbm_to_vmem [thread:$0]  (!%p340_p11), %s135_s25, 128, %s137_s28, [#allocation8]  }
  0x14   : > { %p646_p3 = por %p50_p0, %p49_p13  ;;  %s37_s6 = ssub.s32 %s546_s15, %s739_s29 }
  0x15   : > { %p352_p7 = scmp.lt.s32.totalorder %s550_s16, 2  ;;  %p40_p10 = scmp.eq.s32.totalorder %s37_s6, 0 }
  0x16   : > { %s147_s7 = sand.u32 1, %s538_s14   ;;  %s322_s10 = sshll.u32 %s546_s15, 3 }
  0x17   : > { %s321_s8 = sshll.u32 %s147_s7, 3  ;;  %s156_s18 = scalar_lea.hbm %s723_s1, %s322_s10 }
  0x18   : > { %s661_s9 = scalar_select %p40_p10, %s538_s14, %s42_s30  }
  0x19   : > { %s151_s23 = scalar_lea.vmem [#allocation4], %s321_s8  ;;  %s158_s20 = sshll.u32 %s156_s18, 4  ;;  %s159_s20 = int_to_ptr.hbm [resolvable:$true] %s158_s20 }
  0x1a   : > { %s160_s24 = sshll.u32 %s151_s23, 4  ;;  %p344_p2 = pnand %p352_p7, %p646_p3  ;;  %s161_s24 = int_to_ptr.vmem [resolvable:$true] %s160_s24 }
  0x1b   : > { %s148_s25 = scalar_lea.sflag [#allocation5], %s147_s7  ;;  %169 = sbr.rel (%p630_p8) target bundleno = 50 (0x32), region = 28 }
  0x1c   : > { %346 = dma.hbm_to_vmem [thread:$0]  (!%p344_p2), %s159_s20, 128, %s161_s24, %s148_s25  }
  0x1d   : > { %s672_s27 = sand.u32 (!%p630_p8), 1, %s534_s13  }
  0x1e   : > { %s324_s28 = sshll.u32 (!%p630_p8), %s672_s27, 3  ;;  %s172_s30 = scalar_lea.sflag (!%p630_p8), [#allocation5], %s672_s27 }
  0x1f   : > { %s175_s6 = scalar_lea.vmem (!%p630_p8), [#allocation4], %s324_s28 }
  0x20   : > { %517 = dma.done.wait (%p617_p4), %s172_s30, 128  }
  0x21   : > { %519 = vsyncadd (%p617_p4), %s172_s30, 4294967168 }
  0x22   : > { %521 = dma.done.wait (%p607_p1), [#allocation8], 128  }
  0x23   : > { %523 = vsyncadd (%p607_p1), [#allocation8], 4294967168  ;;  %s328_s26 = sshll.u32 %s542_s0, 3  ;;  %s201_s10 = scalar_lea.vmem [#allocation9], %s324_s28  ;;  %v202_v0 = vld [vmem:[%s175_s6] sm:$0xff]  ;;  %v203_v1 = vld [vmem:[#allocation7] sm:$0xff] }
  0x24   : > { %s219_s8 = scalar_lea.hbm %s725_s3, %s328_s26  ;;  %s221_s11 = sshll.u32 %s201_s10, 4  ;;  %vm205_vm0 = vcmask 261120   ;;  %v204_v2 = vadd.f32 %v203_v1, %v202_v0  ;;  %s222_s11 = int_to_ptr.vmem [resolvable:$true] %s221_s11 }
  0x25   : > { %s223_s17 = sshll.u32 %s219_s8, 4  ;;  %s208_s19 = scalar_lea.sflag [#allocation6], %s672_s27  ;;  %s224_s17 = int_to_ptr.hbm [resolvable:$true] %s223_s17 }
  0x26   : > { %206 = vst.msk [vmem:[%s201_s10] sm:$0xff] %vm205_vm0, %v204_v2  ;;  %s478_s21 = sshra.s32 %s224_s17, 4  ;;  %s484_s24 = scalar_lea.hbm %s725_s3, 16  ;;  %s479_s21 = int_to_ptr.hbm [resolvable:$true] %s478_s21 }
  0x27   : > { %s480_s18 = scalar_lea.hbm %s479_s21, 8  ;;  %p485_p11 = scmp.lt.s32.totalorder %s479_s21, %s725_s3 }
  0x28   : > { %p481_p1 = scmp.ne.s32.totalorder %s479_s21, %s480_s18  ;;  %p486_p12 = scmp.lt.s32.totalorder %s484_s24, %s480_s18 }
  0x2a   : > { %p482_p4 = pnand %p481_p1, %p652_p5  ;;  %p487_p13 = por %p486_p12, %p485_p11 }
  0x2c   : > { %p483_p8 = pneg %p482_p4 }
  0x2e   : > { %p488_p0 = pnand %p487_p13, %p483_p8 }
  0x30   : > { %491 = shalt.err (!%p488_p0)
}
  0x31   : > { %337 = dma.vmem_to_hbm [thread:$0]  (%p652_p5), %s222_s11, 128, %s224_s17, %s208_s19  }
  0x32 PF: > { %s235_s27 = sand.u32 1, %s530_s12   ;;  %p348_p3 = pnand %p320_p9, %p622_p6 }
  0x33   : > { %s236_s28 = scalar_lea.sflag [#allocation6], %s235_s27 }
  0x34   : > { %p349_p7 = pneg %p348_p3 }
  0x36   : > { %525 = dma.done.wait (%p349_p7), %s236_s28, 128  }
  0x37   : > { %527 = vsyncadd (%p349_p7), %s236_s28, 4294967168  ;;  %s21_s16 = sadd.s32 1, %s550_s16   ;;  %s733_s12 = smov %s534_s13 }
  0x38   : > { %p18_p10 = scmp.ge.s32.totalorder %s21_s16, 4   ;;  %s734_s13 = smov %s538_s14 }
  0x39   : > { %s735_s14 = smov %s661_s9  ;;  %s736_s0 = smov %s546_s15 }
  0x3a   : > { %s737_s15 = smov %s739_s29  ;;  %20 = sbr.rel (!%p18_p10) target bundleno = 7 (0x7), region = 78 }
  0x3f   :  { %242 = vsyncpa [#allocation5], 1 }
  0x40   :  { %244 = vsyncpa [#allocation5 + $0x1], 1 }
  0x41   :  { %245 = vsyncpa [#allocation8], 1 }
  0x42   :  { %246 = vsyncpa [#allocation6], 1 }
  0x43   :  { %248 = vsyncpa [#allocation6 + $0x1], 1 }

</bundles_post_ra>
